<compile_context>
chip_gen: v6e
topology: v6e:2x2x1
jax: 0.10.0
libtpu: 0.0.40
codegen_flags: <defaults>
</compile_context>

<pallas_src>
import functools

import jax
import jax.numpy as jnp
from jax.experimental import pallas as pl
from jax.experimental.pallas import tpu as pltpu


def _mlp_fused_kernel(x_ref, *refs, num_layers: int, negative_slope: float):
    """Fused MLP in batch-in-lanes layout.

    refs = (w0, b0, w1, b1, ..., w_{L-1}, b_{L-1}, o_ref)
      x_ref : (d0, tile_m)        -- batch along lanes
      w_i   : (d_{i+1}, d_i)      -- PyTorch-native (out, in)
      b_i   : (d_{i+1}, 1)
      o_ref : (d_L, tile_m)
    Activations are chained as values (vregs); no VMEM staging between layers.
    """
    o_ref = refs[-1]
    h = x_ref[...]                                  # (d_i, tile_m)
    for i in range(num_layers):
        w = refs[2 * i][...]                        # (d_{i+1}, d_i)
        b = refs[2 * i + 1][...]                    # (d_{i+1}, 1)
        h = jnp.dot(w, h, preferred_element_type=jnp.float32) + b
        if i != num_layers - 1:
            # LeakyReLU(0.1): max(h, 0.1*h) == torch semantics (incl. h == 0).
            h = jnp.maximum(h, negative_slope * h)
    o_ref[...] = h.astype(o_ref.dtype)


def _choose_tile_m(M):
    if M <= 2048:
        # Single full-extent block (full-dim blocks are exempt from the
        # 128-lane divisibility rule, so ragged M is fine here).
        return M
    # Lane-dense tiles: multiple of 128, large enough to amortize per-step
    # overhead, capped at 8192 and at cdiv(M, 2) so the grid keeps >= 2
    # independent steps (lets v7x's 2 TensorCores shard them).
    half = -(-M // 2)
    return min(8192, ((half + 127) // 128) * 128)


def mldlzl_mlp_forward(x, params, *, tile_m=None, stream_dtype=None):
    """Reproduces MLDLZL_MLP.forward: Linear -> LeakyReLU(0.1) -> ... -> Linear.

    x       : (M, d0) input (natural layout; transposed to (d0, M) internally
              so the batch maps to vreg lanes).
    params  : list of (W, b) with W shape (out, in) and b shape (out, 1)
              (PyTorch-native weight layout).
    stream_dtype : optional dtype (e.g. jnp.bfloat16) to stream x and W in;
              accumulation, bias add, activation and output stay float32.
    """
    M, d0 = x.shape
    num_layers = len(params)
    out_dim = params[-1][0].shape[0]

    if tile_m is None:
        tile_m = _choose_tile_m(M)

    # Batch-in-lanes layout.  (In a real pipeline keep x stored as (d0, M)
    # upstream to avoid this transpose entirely.)
    x_t = x.T
    if stream_dtype is not None:
        x_t = x_t.astype(stream_dtype)

    grid = (pl.cdiv(M, tile_m),)

    in_specs = [pl.BlockSpec((d0, tile_m), lambda i: (0, i))]
    flat_inputs = [x_t]
    for w, b in params:
        k_out, k_in = w.shape
        # Full-array blocks with constant index_map -> weights/biases stay
        # VMEM-resident across all batch tiles (no re-fetch between steps).
        in_specs.append(pl.BlockSpec((k_out, k_in), lambda i: (0, 0)))
        in_specs.append(pl.BlockSpec((k_out, 1), lambda i: (0, 0)))
        flat_inputs.append(w.astype(stream_dtype) if stream_dtype is not None else w)
        flat_inputs.append(b)  # bias stays f32

    out_specs = pl.BlockSpec((out_dim, tile_m), lambda i: (0, i))

    kernel = functools.partial(
        _mlp_fused_kernel, num_layers=num_layers, negative_slope=0.1
    )

    out_t = pl.pallas_call(
        kernel,
        out_shape=jax.ShapeDtypeStruct((out_dim, M), x.dtype),
        grid=grid,
        in_specs=in_specs,
        out_specs=out_specs,
        compiler_params=pltpu.CompilerParams(
            # Batch tiles are independent: lets v7x shard them across 2 TCs.
            dimension_semantics=("parallel",),
        ),
    )(*flat_inputs)

    return out_t.T  # back to (M, out_dim)


def init_mlp_params(network_structure, key):
    """Deterministic init matching nn.Linear shapes.

    PyTorch nn.Linear(in, out): weight (out, in), bias (out,), both
    U(-1/sqrt(in), 1/sqrt(in)).  We keep the native (out, in) weight layout
    (kernel computes W @ x^T) and store bias as (out, 1).
    """
    params = []
    for i in range(len(network_structure) - 1):
        fan_in = network_structure[i]
        fan_out = network_structure[i + 1]
        key, wk, bk = jax.random.split(key, 3)
        bound = 1.0 / float(jnp.sqrt(jnp.float32(fan_in)))
        w = jax.random.uniform(wk, (fan_out, fan_in), jnp.float32, -bound, bound)
        b = jax.random.uniform(bk, (fan_out, 1), jnp.float32, -bound, bound)
        params.append((w, b))
    return params


def _reference_forward(x, params):
    """Pure-JAX f32 reference of the same forward pass (natural layout)."""
    h = x
    for i, (w, b) in enumerate(params):
        h = h @ w.T + b[:, 0]
        if i != len(params) - 1:
            h = jnp.where(h > 0, h, 0.1 * h)
    return h


# TODO(synk): Loss / kNNGraph / DistanceAndPushAwayLoss / DistanceLoss are
# training-time utilities (sorting, data-dependent boolean masking, host numpy
# transfers) and are not part of forward(); they are not implemented as Pallas
# kernels here.


if __name__ == "__main__":
    # Small shapes consistent with the module: NetworkStructure = [16, 32, 32, 2]
    network_structure = [16, 32, 32, 2]
    batch = 8

    key = jax.random.PRNGKey(0)
    key, xk = jax.random.split(key)
    x = jax.random.normal(xk, (batch, network_structure[0]), jnp.float32)

    params = init_mlp_params(network_structure, key)

    # 1) Small-batch path: single full-extent block, single fused launch.
    out = jax.block_until_ready(mldlzl_mlp_forward(x, params))
    ref = _reference_forward(x, params)
    assert out.shape == (batch, network_structure[-1])
    assert jnp.allclose(out, ref, atol=1e-5, rtol=1e-5)

    # 2) Tiled path with ragged final tile (M not a multiple of tile_m).
    key, xk2 = jax.random.split(key)
    x_rag = jax.random.normal(xk2, (1000, network_structure[0]), jnp.float32)
    out_rag = jax.block_until_ready(mldlzl_mlp_forward(x_rag, params, tile_m=256))
    ref_rag = _reference_forward(x_rag, params)
    assert out_rag.shape == (1000, network_structure[-1])
    assert jnp.allclose(out_rag, ref_rag, atol=1e-5, rtol=1e-5)

    # 3) Default heuristic multi-step path (M > 2048 -> >= 2 grid steps).
    key, xk3 = jax.random.split(key)
    x_big = jax.random.normal(xk3, (4096, network_structure[0]), jnp.float32)
    out_big = jax.block_until_ready(mldlzl_mlp_forward(x_big, params))
    ref_big = _reference_forward(x_big, params)
    assert out_big.shape == (4096, network_structure[-1])
    assert jnp.allclose(out_big, ref_big, atol=1e-5, rtol=1e-5)

    # 4) bf16 streaming of x / W (f32 accumulate, bias, activation, output).
    out_bf16 = jax.block_until_ready(
        mldlzl_mlp_forward(x_big, params, stream_dtype=jnp.bfloat16)
    )
    assert out_bf16.shape == (4096, network_structure[-1])
    assert jnp.allclose(out_bf16, ref_big, atol=5e-2, rtol=5e-2)

    print("KERNEL_OK")
</pallas_src>

<mosaic_0001>
module attributes {stable_mosaic.version = 11 : i64} {
  func.func @_mlp_fused_kernel(%arg0: i32, %arg1: memref<16x8xf32, #tpu.memory_space<vmem>>, %arg2: memref<32x16xf32, #tpu.memory_space<vmem>>, %arg3: memref<32x1xf32, #tpu.memory_space<vmem>>, %arg4: memref<32x32xf32, #tpu.memory_space<vmem>>, %arg5: memref<32x1xf32, #tpu.memory_space<vmem>>, %arg6: memref<2x32xf32, #tpu.memory_space<vmem>>, %arg7: memref<2x1xf32, #tpu.memory_space<vmem>>, %arg8: memref<2x8xf32, #tpu.memory_space<vmem>>) attributes {dimension_semantics = [#tpu.dimension_semantics<parallel>], iteration_bounds = array<i64: 1>, scalar_prefetch = 0 : i64, scratch_operands = 0 : i64, tpu.core_type = #tpu.core_type<tc>, window_params = [{transform_indices = @transform_0, window_bounds = array<i64: 16, 8>}, {pipeline_mode = #tpu.pipeline_mode<synchronous>, transform_indices = @transform_1, window_bounds = array<i64: 32, 16>}, {pipeline_mode = #tpu.pipeline_mode<synchronous>, transform_indices = @transform_2, window_bounds = array<i64: 32, 1>}, {pipeline_mode = #tpu.pipeline_mode<synchronous>, transform_indices = @transform_3, window_bounds = array<i64: 32, 32>}, {pipeline_mode = #tpu.pipeline_mode<synchronous>, transform_indices = @transform_4, window_bounds = array<i64: 32, 1>}, {pipeline_mode = #tpu.pipeline_mode<synchronous>, transform_indices = @transform_5, window_bounds = array<i64: 2, 32>}, {pipeline_mode = #tpu.pipeline_mode<synchronous>, transform_indices = @transform_6, window_bounds = array<i64: 2, 1>}, {transform_indices = @transform_7, window_bounds = array<i64: 2, 8>}]} {
    %c0 = arith.constant 0 : index
    %c0_0 = arith.constant 0 : index
    %0 = vector.load %arg1[%c0, %c0_0] : memref<16x8xf32, #tpu.memory_space<vmem>>, vector<16x8xf32>
    %c0_1 = arith.constant 0 : index
    %c0_2 = arith.constant 0 : index
    %1 = vector.load %arg2[%c0_1, %c0_2] : memref<32x16xf32, #tpu.memory_space<vmem>>, vector<32x16xf32>
    %c0_3 = arith.constant 0 : index
    %c0_4 = arith.constant 0 : index
    %2 = vector.load %arg3[%c0_3, %c0_4] : memref<32x1xf32, #tpu.memory_space<vmem>>, vector<32x1xf32>
    %cst = arith.constant dense<0.000000e+00> : vector<32x8xf32>
    %3 = tpu.matmul %1, %0, %cst {dimension_numbers = #tpu.dot_dimension_numbers<[1], [0], [0], [1], [0, 0, 1, 1], [], []>} : vector<32x16xf32>, vector<16x8xf32>, vector<32x8xf32> -> vector<32x8xf32>
    %4 = vector.broadcast %2 : vector<32x1xf32> to vector<32x8xf32>
    %5 = arith.addf %3, %4 : vector<32x8xf32>
    %cst_5 = arith.constant 1.000000e-01 : f32
    %6 = vector.broadcast %cst_5 : f32 to vector<32x8xf32>
    %7 = arith.mulf %6, %5 : vector<32x8xf32>
    %8 = arith.maximumf %5, %7 : vector<32x8xf32>
    %c0_6 = arith.constant 0 : index
    %c0_7 = arith.constant 0 : index
    %9 = vector.load %arg4[%c0_6, %c0_7] : memref<32x32xf32, #tpu.memory_space<vmem>>, vector<32x32xf32>
    %c0_8 = arith.constant 0 : index
    %c0_9 = arith.constant 0 : index
    %10 = vector.load %arg5[%c0_8, %c0_9] : memref<32x1xf32, #tpu.memory_space<vmem>>, vector<32x1xf32>
    %cst_10 = arith.constant dense<0.000000e+00> : vector<32x8xf32>
    %11 = tpu.matmul %9, %8, %cst_10 {dimension_numbers = #tpu.dot_dimension_numbers<[1], [0], [0], [1], [0, 0, 1, 1], [], []>} : vector<32x32xf32>, vector<32x8xf32>, vector<32x8xf32> -> vector<32x8xf32>
    %12 = vector.broadcast %10 : vector<32x1xf32> to vector<32x8xf32>
    %13 = arith.addf %11, %12 : vector<32x8xf32>
    %cst_11 = arith.constant 1.000000e-01 : f32
    %14 = vector.broadcast %cst_11 : f32 to vector<32x8xf32>
    %15 = arith.mulf %14, %13 : vector<32x8xf32>
    %16 = arith.maximumf %13, %15 : vector<32x8xf32>
    %c0_12 = arith.constant 0 : index
    %c0_13 = arith.constant 0 : index
    %17 = vector.load %arg6[%c0_12, %c0_13] : memref<2x32xf32, #tpu.memory_space<vmem>>, vector<2x32xf32>
    %c0_14 = arith.constant 0 : index
    %c0_15 = arith.constant 0 : index
    %18 = vector.load %arg7[%c0_14, %c0_15] : memref<2x1xf32, #tpu.memory_space<vmem>>, vector<2x1xf32>
    %cst_16 = arith.constant dense<0.000000e+00> : vector<2x8xf32>
    %19 = tpu.matmul %17, %16, %cst_16 {dimension_numbers = #tpu.dot_dimension_numbers<[1], [0], [0], [1], [0, 0, 1, 1], [], []>} : vector<2x32xf32>, vector<32x8xf32>, vector<2x8xf32> -> vector<2x8xf32>
    %20 = vector.broadcast %18 : vector<2x1xf32> to vector<2x8xf32>
    %21 = arith.addf %19, %20 : vector<2x8xf32>
    %c0_17 = arith.constant 0 : index
    %c0_18 = arith.constant 0 : index
    %22 = vector.load %arg8[%c0_17, %c0_18] : memref<2x8xf32, #tpu.memory_space<vmem>>, vector<2x8xf32>
    tpu.vector_store %arg8[%c0_17, %c0_18], %21 {strides = array<i32>} : memref<2x8xf32, #tpu.memory_space<vmem>>, vector<2x8xf32>,
    return
  }
  func.func @transform_0(%arg0: i32) -> (i32, i32) {
    %c0_i32 = arith.constant 0 : i32
    %c0_i32_0 = arith.constant 0 : i32
    return %c0_i32, %arg0 : i32, i32
  }
  func.func @transform_1(%arg0: i32) -> (i32, i32) {
    %c0_i32 = arith.constant 0 : i32
    %c0_i32_0 = arith.constant 0 : i32
    %c0_i32_1 = arith.constant 0 : i32
    return %c0_i32, %c0_i32_0 : i32, i32
  }
  func.func @transform_2(%arg0: i32) -> (i32, i32) {
    %c0_i32 = arith.constant 0 : i32
    %c0_i32_0 = arith.constant 0 : i32
    %c0_i32_1 = arith.constant 0 : i32
    return %c0_i32, %c0_i32_0 : i32, i32
  }
  func.func @transform_3(%arg0: i32) -> (i32, i32) {
    %c0_i32 = arith.constant 0 : i32
    %c0_i32_0 = arith.constant 0 : i32
    %c0_i32_1 = arith.constant 0 : i32
    return %c0_i32, %c0_i32_0 : i32, i32
  }
  func.func @transform_4(%arg0: i32) -> (i32, i32) {
    %c0_i32 = arith.constant 0 : i32
    %c0_i32_0 = arith.constant 0 : i32
    %c0_i32_1 = arith.constant 0 : i32
    return %c0_i32, %c0_i32_0 : i32, i32
  }
  func.func @transform_5(%arg0: i32) -> (i32, i32) {
    %c0_i32 = arith.constant 0 : i32
    %c0_i32_0 = arith.constant 0 : i32
    %c0_i32_1 = arith.constant 0 : i32
    return %c0_i32, %c0_i32_0 : i32, i32
  }
  func.func @transform_6(%arg0: i32) -> (i32, i32) {
    %c0_i32 = arith.constant 0 : i32
    %c0_i32_0 = arith.constant 0 : i32
    %c0_i32_1 = arith.constant 0 : i32
    return %c0_i32, %c0_i32_0 : i32, i32
  }
  func.func @transform_7(%arg0: i32) -> (i32, i32) {
    %c0_i32 = arith.constant 0 : i32
    %c0_i32_0 = arith.constant 0 : i32
    return %c0_i32, %arg0 : i32, i32
  }
}

</mosaic_0001>

<bundles_post_ra>
// kernel: tpu_custom_call.1
= control target key start
LH: loop header
LB: loop body
LE: loop exit
PB: predicated region body
PF: predicated region fallthrough
CT: control target
= control target key end

     0   :  { %vm57_vm0 = vcmask 130048   ;;  %v484_v4 = vmov 0   ;;  %s600_s0 = inlined_call_operand.vmem [shape: f32[16,8], index: 0, kind: input, shape index: {}]   ;;  %s601_s1 = inlined_call_operand.vmem [shape: f32[32,16], index: 1, kind: input, shape index: {}]   ;;  %s602_s2 = inlined_call_operand.vmem [shape: f32[32,1], index: 2, kind: input, shape index: {}]   ;;  %s603_s3 = inlined_call_operand.vmem [shape: f32[32,32], index: 3, kind: input, shape index: {}]   ;;  %s604_s4 = inlined_call_operand.vmem [shape: f32[32,1], index: 4, kind: input, shape index: {}]   ;;  %s605_s5 = inlined_call_operand.vmem [shape: f32[2,32], index: 5, kind: input, shape index: {}]   ;;  %s606_s6 = inlined_call_operand.vmem [shape: f32[2,1], index: 6, kind: input, shape index: {}]   ;;  %s607_s7 = inlined_call_operand.hbm [shape: f32[2,8], index: 7, kind: output, shape index: {}]  }
   0x1   :  { %v28_v0 = vld [vmem:[%s600_s0 + $0x8] sm:$0xff]  ;;  %v27_v1 = vld [vmem:[%s600_s0] sm:$0xff]  ;;  %460 = vset.pattern.permute.xlu0 %v484_v4  ;;  %v36_v5 = vld [vmem:[%s602_s2 + $0x18] sm:$0xff]  ;;  %461 = vset.pattern.permute.xlu1 %v484_v4 }
   0x2   :  { %v29_v2 = vld [vmem:[%s601_s1] sm:$0xff]  ;;  %421 = vmatprep.subr.mxu0 %v28_v0  ;;  %v30_v3 = vld [vmem:[%s601_s1 + $0x8] sm:$0xff]  ;;  %v31_v6 = vld [vmem:[%s601_s1 + $0x10] sm:$0xff]  ;;  %54 = vperm.xlu0 %460, %v36_v5  }
   0x3   :  { %425 = vmatprep.mubr.msk.f32.mxu0 %vm57_vm0, %v29_v2  ;;  %422 = vmatpush3.msra.mxu0 %v28_v0  ;;  %v34_v7 = vld [vmem:[%s602_s2 + $0x8] sm:$0xff]  ;;  %v35_v8 = vld [vmem:[%s602_s2 + $0x10] sm:$0xff] }
   0x4   :  { %423 = vmatprep.subr.mxu0 %v27_v1  ;;  %44 = vperm.xlu1 %461, %v34_v7  }
   0x5   :  { %424 = vmatpush3.msra.mxu0 %v27_v1 }
   0x6   :  { %426 = vmatmul.mubr.msk.f32.vlgmr.msra.gmra.mxu0 %vm57_vm0, %v30_v3 }
   0x7   :  { %12 = vsyncpa [#allocation3], 0  ;;  %428 = vmatprep.mubr.msk.f32.mxu0 %vm57_vm0, %v31_v6  ;;  %v32_v9 = vld [vmem:[%s601_s1 + $0x18] sm:$0xff]  ;;  %v33_v10 = vld [vmem:[%s602_s2] sm:$0xff]  ;;  %49 = vperm.xlu0 %460, %v35_v8   ;;  %vm191_vm1 = vcmask 261120   ;;  %v485_v40 = vmov 0.0  }
   0x8   :  { %v170_v11 = vld [vmem:[%s604_s4 + $0x18] sm:$0xff]  ;;  %39 = vperm.xlu1 %461, %v33_v10   ;;  %v169_v12 = vld [vmem:[%s604_s4 + $0x10] sm:$0xff]  ;;  %v168_v13 = vld [vmem:[%s604_s4 + $0x8] sm:$0xff]  ;;  %445 = vmatprep.subr.mxu0 %v485_v40  ;;  %vm486_vm2 = vmmov 0   ;;  %s487_s11 = smov [#allocation2]   ;;  %vm377_vm3 = vcmask 58368  }
   0x9   :  { %v167_v14 = vld [vmem:[%s604_s4] sm:$0xff]  ;;  %v164_v37 = vld [vmem:[%s603_s3 + $0x8] sm:$0xff]  ;;  %v165_v38 = vld [vmem:[%s603_s3 + $0x10] sm:$0xff]  ;;  %s385_s12 = sshll.u32 %s487_s11, 4  ;;  %s386_s12 = int_to_ptr.vmem [resolvable:$true] %s385_s12 }
   0xa   :  { %429 = vmatmul.mubr.msk.f32.gmra.mxu0 %vm57_vm0, %v32_v9  ;;  %v298_v15 = vld [vmem:[%s606_s6] sm:$0x3]  ;;  %v166_v39 = vld [vmem:[%s603_s3 + $0x18] sm:$0xff]  ;;  %s462_s13 = scalar_lea.vmem %s386_s12, 32  ;;  %p467_p1 = scmp.lt.s32.totalorder %s386_s12, %s386_s12 }
   0xb   :  { %188 = vperm.xlu0 %460, %v170_v11   ;;  %v163_v16 = vld [vmem:[%s603_s3] sm:$0xff]  ;;  %453 = vmatprep.mubr.msk.f32.mxu0 %vm486_vm2, %v485_v40  ;;  %p463_p0 = scmp.ne.s32.totalorder %s386_s12, %s462_s13  ;;  %p468_p2 = scmp.lt.s32.totalorder %s462_s13, %s462_s13 }
   0xc   :  { %183 = vperm.xlu1 %461, %v169_v12   ;;  %439 = vmatprep.mubr.msk.f32.mxu1 %vm191_vm1, %v163_v16  ;;  %v297_v61 = vld [vmem:[%s605_s5] sm:$0x3] }
   0xd   :  { %p469_p3 = por %p468_p2, %p467_p1 }
   0xf   :  { %178 = vperm.xlu0 %460, %v168_v13   ;;  %p470_p4 = pnand %p469_p3, %p463_p0 }
  0x10   :  { %173 = vperm.xlu1 %461, %v167_v14  }
  0x13   :  { %301 = vperm.xlu0 %460, %v298_v15  }
  0x7d   :  { %v55_v17 = vpop.permute.xlu0 %54 }
  0x7f   :  { %v45_v18 = vpop.permute.xlu1 %44 }
  0x82   :  { %v50_v22 = vpop.permute.xlu0 %49 }
  0x83   :  { %v40_v25 = vpop.permute.xlu1 %39 }
  0x86   :  { %v189_v41 = vpop.permute.xlu0 %188 }
  0x87   :  { %v184_v42 = vpop.permute.xlu1 %183 }
  0x8a   :  { %v179_v45 = vpop.permute.xlu0 %178 }
  0x8b   :  { %v174_v49 = vpop.permute.xlu1 %173 }
  0x8e   :  { %v302_v62 = vpop.permute.xlu0 %301 }
  0xc6   :  { %v427_v19 = vpop.f32.mrf.mxu0 }
  0xc7   :  { %v142_v23 = vadd.f32 %v427_v19, %v45_v18 }
  0xc8   :  { %v136_v20 = vpop.f32.mrf.mxu0 }
  0xc9   :  { %v137_v27 = vadd.f32 %v136_v20, %v40_v25  ;;  %v156_v30 = vmul.f32 0.1, %v142_v23 }
  0xca   :  { %v430_v21 = vpop.f32.mrf.mxu0 }
  0xcb   :  { %v152_v24 = vadd.f32 %v430_v21, %v55_v17  ;;  %v155_v33 = vmul.f32 0.1, %v137_v27  ;;  %v160_v35 = vmax.f32 %v142_v23, %v156_v30 }
  0xcc   :  { %v146_v26 = vpop.f32.mrf.mxu0 }
  0xcd   :  { %v158_v28 = vmul.f32 0.1, %v152_v24  ;;  %v147_v29 = vadd.f32 %v146_v26, %v50_v22  ;;  %v159_v36 = vmax.f32 %v137_v27, %v155_v33 }
  0xcf   :  { %v157_v31 = vmul.f32 0.1, %v147_v29  ;;  %v162_v32 = vmax.f32 %v152_v24, %v158_v28 }
  0xd1   :  { %v161_v34 = vmax.f32 %v147_v29, %v157_v31  ;;  %431 = vmatprep.subr.mxu1 %v162_v32 }
  0xd2   :  { %432 = vmatpush3.msra.mxu1 %v162_v32 }
  0xd3   :  { %433 = vmatprep.subr.mxu1 %v161_v34 }
  0xd4   :  { %434 = vmatpush3.msra.mxu1 %v161_v34 }
  0xd5   :  { %435 = vmatprep.subr.mxu1 %v160_v35 }
  0xd6   :  { %436 = vmatpush3.msra.mxu1 %v160_v35 }
  0xd7   :  { %437 = vmatprep.subr.mxu1 %v159_v36 }
  0xd8   :  { %438 = vmatpush3.msra.mxu1 %v159_v36 }
  0xd9   :  { %440 = vmatmul.mubr.msk.f32.vlgmr.msra.gmra.mxu1 %vm191_vm1, %v164_v37 }
  0xda   :  { %442 = vmatprep.mubr.msk.f32.mxu1 %vm191_vm1, %v165_v38 }
  0xdd   :  { %443 = vmatmul.mubr.msk.f32.gmra.mxu1 %vm191_vm1, %v166_v39 }
 0x199   :  { %v441_v43 = vpop.f32.mrf.mxu1 }
 0x19a   :  { %v276_v47 = vadd.f32 %v441_v43, %v179_v45 }
 0x19b   :  { %v270_v44 = vpop.f32.mrf.mxu1 }
 0x19c   :  { %v271_v51 = vadd.f32 %v270_v44, %v174_v49  ;;  %v290_v54 = vmul.f32 0.1, %v276_v47 }
 0x19d   :  { %v444_v46 = vpop.f32.mrf.mxu1 }
 0x19e   :  { %v286_v48 = vadd.f32 %v444_v46, %v189_v41  ;;  %v289_v57 = vmul.f32 0.1, %v271_v51  ;;  %v294_v59 = vmax.f32 %v276_v47, %v290_v54 }
 0x19f   :  { %v280_v50 = vpop.f32.mrf.mxu1 }
 0x1a0   :  { %v292_v52 = vmul.f32 0.1, %v286_v48  ;;  %v281_v53 = vadd.f32 %v280_v50, %v184_v42  ;;  %v293_v60 = vmax.f32 %v271_v51, %v289_v57 }
 0x1a2   :  { %v296_v55 = vmax.f32 %v286_v48, %v292_v52  ;;  %v291_v56 = vmul.f32 0.1, %v281_v53 }
 0x1a4   :  { %v295_v58 = vmax.f32 %v281_v53, %v291_v56  ;;  %446 = vmatpush3.msra.mxu0 %v296_v55 }
 0x1a5   :  { %447 = vmatprep.subr.mxu0 %v485_v40 }
 0x1a6   :  { %448 = vmatpush3.msra.mxu0 %v295_v58 }
 0x1a7   :  { %449 = vmatprep.subr.mxu0 %v485_v40 }
 0x1a8   :  { %450 = vmatpush3.msra.mxu0 %v294_v59 }
 0x1a9   :  { %451 = vmatprep.subr.mxu0 %v485_v40 }
 0x1aa   :  { %452 = vmatpush3.msra.mxu0 %v293_v60 }
 0x1ab   :  { %454 = vmatmul.mubr.msk.f32.vlgmr.msra.gmra.mxu0 %vm191_vm1, %v297_v61 }
 0x26b   :  { %v373_v63 = vpop.f32.mrf.mxu0 }
 0x26c   :  { %v374_v0 = vadd.f32 %v373_v63, %v302_v62 }
 0x26d   :  { %v455_v1 = vpop.f32.mrf.mxu0 }
 0x26e   :  { %378 = vst.msk [vmem:[#allocation2] sm:$0x3] %vm377_vm3, %v374_v0 }
 0x26f   :  { %473 = shalt.err (!%p470_p4)
}
 0x270   :  { %388 = dma.vmem_to_hbm [thread:$0]  %s386_s12, 32, %s607_s7, [#allocation3]  }
 0x271   :  { %482 = dma.done.wait [#allocation3], 32  }
 0x272   :  { %483 = vsyncadd [#allocation3], 4294967264 }
 0x273   :  { %392 = vsyncpa [#allocation3], 1 }

</bundles_post_ra>
